<compile_context>
chip_gen: v7x
topology: tpu7x:2x2x1
jax: 0.10.0
libtpu: 0.0.40
codegen_flags: <defaults>
</compile_context>

<pallas_src>
import numpy as np
import jax
import jax.numpy as jnp
from jax import lax
from jax.experimental import pallas as pl
from jax.experimental.pallas import tpu as pltpu

NEG_INF = -1e30
VMEM_LIMIT = 64 * 1024 * 1024   # <= physical VMEM on v5e/v6e (128 MiB) and v7x (64 MiB / TC)


def _pick_tile_n():
    # 256 matches the 2x256^2 MXU on v6e/v7x; keep 128 on v5e (4x128^2 MXU, tighter VMEM).
    try:
        kind = jax.devices()[0].device_kind.lower()
    except Exception:
        return 128
    return 128 if "v5" in kind else 256


# --------------------------------------------------------------------------- #
# Kernel 1: h = x @ W (bf16 out) + per-node attention scores
#   s_src[j] = a_src . h_j  -> emitted lane-major as a (1, Np) row
#   s_dst[i] = a_dst . h_i  -> emitted as a (Np, 1) column
# --------------------------------------------------------------------------- #
def linear_kernel(x_ref, w_ref, a_src_ref, a_dst_ref, h_ref, ssrc_ref, sdst_ref):
    h = jnp.dot(x_ref[...], w_ref[...], preferred_element_type=jnp.float32)   # (tile_n, H) f32
    h_ref[...] = h.astype(jnp.bfloat16)
    # lane-major (1, tile_n) row via MXU contraction over H (avoids an XLU transpose)
    ssrc_ref[...] = lax.dot_general(a_src_ref[...], h, (((1,), (1,)), ((), ())),
                                    preferred_element_type=jnp.float32)
    sdst_ref[...] = lax.dot_general(h, a_dst_ref[...], (((1,), (1,)), ((), ())),
                                    preferred_element_type=jnp.float32)


# --------------------------------------------------------------------------- #
# Kernel 2: GAT attention + aggregation + bias + ReLU + fused per-tile max pool
# --------------------------------------------------------------------------- #
def gat_pool_kernel(h_ref, ssrc_ref, sdst_ref, ones_ref, bias_ref, batch_ref,
                    adj_ref, out_ref):
    # e[i, j] = LeakyReLU(a_dst.h_i + a_src.h_j), masked to the adjacency (all f32)
    e = sdst_ref[...] + ssrc_ref[...]                       # (tile_n, Np)
    e = jnp.where(e > 0, e, 0.2 * e)                        # leaky_relu(0.2)
    e = jnp.where(adj_ref[...] != 0, e, NEG_INF)

    # softmax numerator: max-subtract in f32, exp on the bf16 EUP path.
    # Masked logits (~ -1e30) underflow to exactly 0 after exp.
    m = jnp.max(e, axis=-1, keepdims=True)                  # (tile_n, 1)  (XLU)
    p = jnp.exp((e - m).astype(jnp.bfloat16))               # (tile_n, Np) bf16

    # denominator on the MXU (f32 accumulate), normalize AFTER the aggregation matmul.
    denom = jnp.dot(p, ones_ref[...], preferred_element_type=jnp.float32)    # (tile_n, 1)
    agg = jnp.dot(p, h_ref[...], preferred_element_type=jnp.float32)         # (tile_n, H)
    act = agg * pl.reciprocal(denom, approx=True) + bias_ref[...]
    act = jnp.maximum(act, 0.0)                             # ReLU

    # fused global max pool: per-graph partial max for this dst tile.
    # Identity 0.0 is safe because post-ReLU activations are >= 0.
    b = batch_ref[...]                                      # (tile_n, 1) int32
    num_graphs = out_ref.shape[1]
    rows = []
    for g in range(num_graphs):                             # G is small & static
        rows.append(jnp.max(jnp.where(b == g, act, 0.0), axis=0, keepdims=True))
    out_ref[...] = jnp.concatenate(rows, axis=0)[None]      # (1, G, H)


# --------------------------------------------------------------------------- #
# Wrapper
# --------------------------------------------------------------------------- #
def mcd_gnn_forward(x, edge_index, batch, params, num_graphs, tile_n=None):
    if tile_n is None:
        tile_n = _pick_tile_n()
    N, F = x.shape
    H = params["w"].shape[1]
    n_pad = pl.cdiv(N, tile_n) * tile_n
    pad = n_pad - N
    grid_rows = n_pad // tile_n

    # pad nodes so every MXU pass has a full M tile
    x_p = jnp.pad(x, ((0, pad), (0, 0)))
    # padded rows get an out-of-range graph id -> never pooled
    batch_p = jnp.pad(batch.astype(jnp.int32), (0, pad),
                      constant_values=num_graphs)[:, None]                 # (Np, 1)

    # dense int8 adjacency: adj[dst, src] = 1; GATConv has add_self_loops=True.
    # int8 keeps the only O(N^2) operand at 1/4 the f32 DMA / VMEM footprint.
    # TODO(synk): exploit the block-diagonal structure (contiguous nodes per graph) via
    # scalar-prefetched per-tile source windows so the inner width shrinks from Np to the
    # max graph size and h no longer needs to stay fully VMEM-resident.
    src, dst = edge_index
    adj = jnp.zeros((n_pad, n_pad), jnp.int8).at[dst, src].set(jnp.int8(1))
    adj = jnp.maximum(adj, jnp.eye(n_pad, dtype=jnp.int8))                 # self-loops

    ones_col = jnp.ones((n_pad, 1), jnp.bfloat16)                          # MXU denom column

    cparams = pltpu.CompilerParams(dimension_semantics=("parallel",),
                                   vmem_limit_bytes=VMEM_LIMIT)

    # ---- kernel 1: h (bf16) + s_src row + s_dst column ------------------------
    h, s_src, s_dst = pl.pallas_call(
        linear_kernel,
        out_shape=(jax.ShapeDtypeStruct((n_pad, H), jnp.bfloat16),
                   jax.ShapeDtypeStruct((1, n_pad), jnp.float32),
                   jax.ShapeDtypeStruct((n_pad, 1), jnp.float32)),
        grid=(grid_rows,),
        in_specs=[pl.BlockSpec((tile_n, F), lambda i: (i, 0)),
                  pl.BlockSpec((F, H), lambda i: (0, 0)),
                  pl.BlockSpec((1, H), lambda i: (0, 0)),
                  pl.BlockSpec((1, H), lambda i: (0, 0))],
        out_specs=[pl.BlockSpec((tile_n, H), lambda i: (i, 0)),
                   pl.BlockSpec((1, tile_n), lambda i: (0, i)),
                   pl.BlockSpec((tile_n, 1), lambda i: (i, 0))],
        compiler_params=cparams,
    )(x_p.astype(jnp.bfloat16), params["w"].astype(jnp.bfloat16),
      params["a_src"], params["a_dst"])

    # ---- kernel 2: attention + aggregation + ReLU + fused per-tile max pool ---
    partial = pl.pallas_call(
        gat_pool_kernel,
        out_shape=jax.ShapeDtypeStruct((grid_rows, num_graphs, H), jnp.float32),
        grid=(grid_rows,),
        in_specs=[pl.BlockSpec((n_pad, H), lambda i: (0, 0)),       # h (bf16), resident
                  pl.BlockSpec((1, n_pad), lambda i: (0, 0)),       # s_src row, resident
                  pl.BlockSpec((tile_n, 1), lambda i: (i, 0)),      # s_dst column tile
                  pl.BlockSpec((n_pad, 1), lambda i: (0, 0)),       # ones column (bf16)
                  pl.BlockSpec((1, H), lambda i: (0, 0)),           # bias
                  pl.BlockSpec((tile_n, 1), lambda i: (i, 0)),      # batch ids (int32)
                  pl.BlockSpec((tile_n, n_pad), lambda i: (i, 0))], # adj row tile (int8)
        out_specs=pl.BlockSpec((1, num_graphs, H), lambda i: (i, 0, 0)),
        compiler_params=cparams,
    )(h, s_src, s_dst, ones_col, params["bias"], batch_p, adj)

    # tiny finishing reduction over dst-row tiles (keeps the grid axis "parallel")
    return jnp.max(partial, axis=0)


# --------------------------------------------------------------------------- #
# Pure-JAX edge-wise reference (mirrors torch_geometric GATConv semantics, f32)
# --------------------------------------------------------------------------- #
def mcd_gnn_reference(x, edge_index, batch, params, num_graphs):
    N = x.shape[0]
    h = x @ params["w"]
    s_src = jnp.sum(h * params["a_src"], axis=-1)
    s_dst = jnp.sum(h * params["a_dst"], axis=-1)
    loops = jnp.arange(N)
    src = jnp.concatenate([edge_index[0], loops])
    dst = jnp.concatenate([edge_index[1], loops])
    e = s_src[src] + s_dst[dst]
    e = jnp.where(e > 0, e, 0.2 * e)
    e_max = jax.ops.segment_max(e, dst, num_segments=N)
    p = jnp.exp(e - e_max[dst])
    denom = jax.ops.segment_sum(p, dst, num_segments=N)
    alpha = p / denom[dst]
    out = jax.ops.segment_sum(alpha[:, None] * h[src], dst, num_segments=N) + params["bias"]
    out = jnp.maximum(out, 0.0)
    return jax.ops.segment_max(out, batch, num_segments=num_graphs)


if __name__ == "__main__":
    # Small shapes consistent with the module (in_feature_dim, hidden_dim scaled down).
    G, nodes_per_graph = 4, 56          # N = 224 -> padded to 256 inside the wrapper
    N = G * nodes_per_graph
    F, H = 256, 128

    key = jax.random.PRNGKey(0)
    kx, kw, ksrc, kdst, kadj = jax.random.split(key, 5)

    # node features
    x = jax.random.normal(kx, (N, F), jnp.float32)

    # deterministic GATConv parameters (glorot-like scale, bias zeros as in PyG)
    w = jax.random.normal(kw, (F, H), jnp.float32) * (1.0 / np.sqrt(F))
    a_src = jax.random.normal(ksrc, (1, H), jnp.float32) * (1.0 / np.sqrt(H))
    a_dst = jax.random.normal(kdst, (1, H), jnp.float32) * (1.0 / np.sqrt(H))
    bias = jnp.zeros((1, H), jnp.float32)
    params = dict(w=w, a_src=a_src, a_dst=a_dst, bias=bias)

    # batch assignment: contiguous blocks of nodes per graph
    batch = jnp.repeat(jnp.arange(G, dtype=jnp.int32), nodes_per_graph)

    # random edges restricted to within-graph connectivity, no self loops
    block = (batch[:, None] == batch[None, :])
    dense = jax.random.bernoulli(kadj, 0.3, (N, N)) & block & (~jnp.eye(N, dtype=bool))
    dst_np, src_np = np.nonzero(np.asarray(dense))           # dense[dst, src] = 1
    edge_index = jnp.stack([jnp.asarray(src_np, jnp.int32),
                            jnp.asarray(dst_np, jnp.int32)])

    out = mcd_gnn_forward(x, edge_index, batch, params, G)
    out = jax.block_until_ready(out)

    ref = mcd_gnn_reference(x, edge_index, batch, params, G)
    # bf16 MXU inputs / bf16 h / bf16 EUP exp + approx reciprocal -> relaxed tolerance
    np.testing.assert_allclose(np.asarray(out), np.asarray(ref), rtol=5e-2, atol=5e-2)

    print("KERNEL_OK")
</pallas_src>

<mosaic_0001>
module attributes {stable_mosaic.version = 11 : i64} {
  func.func @linear_kernel(%arg0: i32, %arg1: memref<256x256xbf16, #tpu.memory_space<vmem>>, %arg2: memref<256x128xbf16, #tpu.memory_space<vmem>>, %arg3: memref<1x128xf32, #tpu.memory_space<vmem>>, %arg4: memref<1x128xf32, #tpu.memory_space<vmem>>, %arg5: memref<256x128xbf16, #tpu.memory_space<vmem>>, %arg6: memref<1x256xf32, #tpu.memory_space<vmem>>, %arg7: memref<256x1xf32, #tpu.memory_space<vmem>>) attributes {dimension_semantics = [#tpu.dimension_semantics<parallel>], iteration_bounds = array<i64: 1>, scalar_prefetch = 0 : i64, scratch_operands = 0 : i64, tpu.core_type = #tpu.core_type<tc>, window_params = [{transform_indices = @transform_0, window_bounds = array<i64: 256, 256>}, {pipeline_mode = #tpu.pipeline_mode<synchronous>, transform_indices = @transform_1, window_bounds = array<i64: 256, 128>}, {pipeline_mode = #tpu.pipeline_mode<synchronous>, transform_indices = @transform_2, window_bounds = array<i64: 1, 128>}, {pipeline_mode = #tpu.pipeline_mode<synchronous>, transform_indices = @transform_3, window_bounds = array<i64: 1, 128>}, {transform_indices = @transform_4, window_bounds = array<i64: 256, 128>}, {transform_indices = @transform_5, window_bounds = array<i64: 1, 256>}, {transform_indices = @transform_6, window_bounds = array<i64: 256, 1>}]} {
    %c0 = arith.constant 0 : index
    %c0_0 = arith.constant 0 : index
    %0 = vector.load %arg1[%c0, %c0_0] : memref<256x256xbf16, #tpu.memory_space<vmem>>, vector<256x256xbf16>
    %c0_1 = arith.constant 0 : index
    %c0_2 = arith.constant 0 : index
    %1 = vector.load %arg2[%c0_1, %c0_2] : memref<256x128xbf16, #tpu.memory_space<vmem>>, vector<256x128xbf16>
    %cst = arith.constant dense<0.000000e+00> : vector<256x128xf32>
    %2 = tpu.matmul %0, %1, %cst {dimension_numbers = #tpu.dot_dimension_numbers<[1], [0], [0], [1], [0, 0, 1, 1], [], []>} : vector<256x256xbf16>, vector<256x128xbf16>, vector<256x128xf32> -> vector<256x128xf32>
    %3 = arith.truncf %2 : vector<256x128xf32> to vector<256x128xbf16>
    %c0_3 = arith.constant 0 : index
    %c0_4 = arith.constant 0 : index
    %4 = vector.load %arg5[%c0_3, %c0_4] : memref<256x128xbf16, #tpu.memory_space<vmem>>, vector<256x128xbf16>
    tpu.vector_store %arg5[%c0_3, %c0_4], %3 {strides = array<i32>} : memref<256x128xbf16, #tpu.memory_space<vmem>>, vector<256x128xbf16>,
    %c0_5 = arith.constant 0 : index
    %c0_6 = arith.constant 0 : index
    %5 = vector.load %arg3[%c0_5, %c0_6] : memref<1x128xf32, #tpu.memory_space<vmem>>, vector<1x128xf32>
    %cst_7 = arith.constant dense<0.000000e+00> : vector<1x256xf32>
    %6 = tpu.matmul %5, %2, %cst_7 {dimension_numbers = #tpu.dot_dimension_numbers<[1], [1], [0], [0], [0, 0, 1, 0], [], []>} : vector<1x128xf32>, vector<256x128xf32>, vector<1x256xf32> -> vector<1x256xf32>
    %c0_8 = arith.constant 0 : index
    %c0_9 = arith.constant 0 : index
    %7 = vector.load %arg6[%c0_8, %c0_9] : memref<1x256xf32, #tpu.memory_space<vmem>>, vector<1x256xf32>
    tpu.vector_store %arg6[%c0_8, %c0_9], %6 {strides = array<i32>} : memref<1x256xf32, #tpu.memory_space<vmem>>, vector<1x256xf32>,
    %c0_10 = arith.constant 0 : index
    %c0_11 = arith.constant 0 : index
    %8 = vector.load %arg4[%c0_10, %c0_11] : memref<1x128xf32, #tpu.memory_space<vmem>>, vector<1x128xf32>
    %cst_12 = arith.constant dense<0.000000e+00> : vector<256x1xf32>
    %9 = tpu.matmul %2, %8, %cst_12 {dimension_numbers = #tpu.dot_dimension_numbers<[1], [1], [0], [0], [0, 0, 1, 0], [], []>} : vector<256x128xf32>, vector<1x128xf32>, vector<256x1xf32> -> vector<256x1xf32>
    %c0_13 = arith.constant 0 : index
    %c0_14 = arith.constant 0 : index
    %10 = vector.load %arg7[%c0_13, %c0_14] : memref<256x1xf32, #tpu.memory_space<vmem>>, vector<256x1xf32>
    tpu.vector_store %arg7[%c0_13, %c0_14], %9 {strides = array<i32>} : memref<256x1xf32, #tpu.memory_space<vmem>>, vector<256x1xf32>,
    return
  }
  func.func @transform_0(%arg0: i32) -> (i32, i32) {
    %c0_i32 = arith.constant 0 : i32
    %c0_i32_0 = arith.constant 0 : i32
    return %arg0, %c0_i32 : i32, i32
  }
  func.func @transform_1(%arg0: i32) -> (i32, i32) {
    %c0_i32 = arith.constant 0 : i32
    %c0_i32_0 = arith.constant 0 : i32
    %c0_i32_1 = arith.constant 0 : i32
    return %c0_i32, %c0_i32_0 : i32, i32
  }
  func.func @transform_2(%arg0: i32) -> (i32, i32) {
    %c0_i32 = arith.constant 0 : i32
    %c0_i32_0 = arith.constant 0 : i32
    %c0_i32_1 = arith.constant 0 : i32
    return %c0_i32, %c0_i32_0 : i32, i32
  }
  func.func @transform_3(%arg0: i32) -> (i32, i32) {
    %c0_i32 = arith.constant 0 : i32
    %c0_i32_0 = arith.constant 0 : i32
    %c0_i32_1 = arith.constant 0 : i32
    return %c0_i32, %c0_i32_0 : i32, i32
  }
  func.func @transform_4(%arg0: i32) -> (i32, i32) {
    %c0_i32 = arith.constant 0 : i32
    %c0_i32_0 = arith.constant 0 : i32
    return %arg0, %c0_i32 : i32, i32
  }
  func.func @transform_5(%arg0: i32) -> (i32, i32) {
    %c0_i32 = arith.constant 0 : i32
    %c0_i32_0 = arith.constant 0 : i32
    return %c0_i32, %arg0 : i32, i32
  }
  func.func @transform_6(%arg0: i32) -> (i32, i32) {
    %c0_i32 = arith.constant 0 : i32
    %c0_i32_0 = arith.constant 0 : i32
    return %arg0, %c0_i32 : i32, i32
  }
}

</mosaic_0001>

<bundles_post_ra>
// kernel: tpu_custom_call.1
= control target key start
LH: loop header
LB: loop body
LE: loop exit
PB: predicated region body
PF: predicated region fallthrough
CT: control target
= control target key end

     0   :  { %12 = vsyncpa [#allocation3], 0  ;;  %s1856_s0 = inlined_call_operand.hbm [shape: bf16[256,256], index: 0, kind: input, shape index: {}]   ;;  %s1857_s1 = inlined_call_operand.hbm [shape: bf16[256,128], index: 1, kind: input, shape index: {}]   ;;  %s1858_s2 = inlined_call_operand.hbm [shape: f32[1,128], index: 2, kind: input, shape index: {}]   ;;  %s1859_s3 = inlined_call_operand.hbm [shape: f32[1,128], index: 3, kind: input, shape index: {}]   ;;  %s1860_s4 = inlined_call_operand.hbm [shape: bf16[256,128], index: 4, kind: output, shape index: {0}]   ;;  %s1861_s5 = inlined_call_operand.hbm [shape: f32[1,256], index: 5, kind: output, shape index: {1}]   ;;  %s1862_s6 = inlined_call_operand.hbm [shape: f32[256,1], index: 6, kind: output, shape index: {2}]  }
   0x1   :  { %13 = vsyncpa [#allocation6], 0 }
   0x2   :  { %14 = vsyncpa [#allocation9], 0 }
   0x3   :  { %15 = vsyncpa [#allocation4], 0 }
   0x4   :  { %16 = vsyncpa [#allocation12], 0  ;;  %s1636_s21 = smov [#allocation5]   ;;  %s1472_s25 = scalar_lea.hbm %s1857_s1, 2048 }
   0x5   :  { %s34_s22 = sshll.u32 %s1636_s21, 4  ;;  %p1473_p0 = scmp.ne.s32.totalorder %s1857_s1, %s1472_s25  ;;  %s35_s22 = int_to_ptr.vmem [resolvable:$true] %s34_s22 }
   0x6   :  { %p1476_p1 = scmp.lt.u32.totalorder %s1472_s25, %s1857_s1 }
   0x8   :  { %p1478_p2 = pnand %p1476_p1, %p1473_p0 }
   0xa   :  { %1481 = shalt.err (!%p1478_p2)
}
   0xb   :  { %s1482_s30 = scalar_lea.vmem %s35_s22, 2048  ;;  %p1487_p4 = scmp.lt.s32.totalorder %s35_s22, %s35_s22 }
   0xc   :  { %p1483_p3 = scmp.ne.s32.totalorder %s35_s22, %s1482_s30  ;;  %p1488_p5 = scmp.lt.s32.totalorder %s1482_s30, %s1482_s30 }
   0xe   :  { %p1489_p6 = por %p1488_p5, %p1487_p4 }
  0x10   :  { %p1490_p7 = pnand %p1489_p6, %p1483_p3 }
  0x12   :  { %1493 = shalt.err (!%p1490_p7)
}
  0x13   :  { %s1637_s7 = smov 64   ;;  %s1638_s8 = smov 4  }
  0x14   :  { %40 = dma.hbm_to_vmem [thread:$0]  %s1857_s1, 2048, %s35_s22, [#allocation6], %s1637_s7, %s1637_s7, %s1638_s8  }
  0x15   :  { %s1639_s11 = smov [#allocation2]   ;;  %s1494_s15 = scalar_lea.hbm %s1856_s0, 4096 }
  0x16   :  { %s22_s12 = sshll.u32 %s1639_s11, 4  ;;  %p1495_p8 = scmp.ne.s32.totalorder %s1856_s0, %s1494_s15  ;;  %s23_s12 = int_to_ptr.vmem [resolvable:$true] %s22_s12 }
  0x17   :  { %p1498_p9 = scmp.lt.u32.totalorder %s1494_s15, %s1856_s0 }
  0x19   :  { %p1500_p10 = pnand %p1498_p9, %p1495_p8 }
  0x1b   :  { %1503 = shalt.err (!%p1500_p10)
}
  0x1c   :  { %s1504_s20 = scalar_lea.vmem %s23_s12, 4096  ;;  %p1509_p12 = scmp.lt.s32.totalorder %s23_s12, %s23_s12 }
  0x1d   :  { %p1505_p11 = scmp.ne.s32.totalorder %s23_s12, %s1504_s20  ;;  %p1510_p13 = scmp.lt.s32.totalorder %s1504_s20, %s1504_s20 }
  0x1f   :  { %p1511_p0 = por %p1510_p13, %p1509_p12 }
  0x21   :  { %p1512_p1 = pnand %p1511_p0, %p1505_p11 }
  0x23   :  { %1515 = shalt.err (!%p1512_p1)
}
  0x24   :  { %s1640_s1 = smov 128   ;;  %s1641_s21 = smov 8  }
  0x25   :  { %28 = dma.hbm_to_vmem [thread:$0]  %s1856_s0, 4096, %s23_s12, [#allocation3], %s1640_s1, %s1640_s1, %s1641_s21  }
  0x26   :  { %s1642_s24 = smov [#allocation7]   ;;  %s1643_s26 = smov [#allocation8]  }
  0x27   :  { %s47_s25 = sshll.u32 %s1642_s24, 4  ;;  %s57_s27 = sshll.u32 %s1643_s26, 4  ;;  %s48_s25 = int_to_ptr.vmem [resolvable:$true] %s47_s25  ;;  %s58_s27 = int_to_ptr.vmem [resolvable:$true] %s57_s27 }
  0x28   :  { %s1516_s30 = scalar_lea.hbm %s1858_s2, 16 }
  0x29   :  { %p1517_p2 = scmp.ne.s32.totalorder %s1858_s2, %s1516_s30  ;;  %p1520_p3 = scmp.lt.u32.totalorder %s1516_s30, %s1858_s2 }
  0x2b   :  { %p1522_p4 = pnand %p1520_p3, %p1517_p2 }
  0x2d   :  { %1525 = shalt.err (!%p1522_p4)
}
  0x2e   :  { %s1526_s0 = scalar_lea.vmem %s48_s25, 16  ;;  %s1530_s12 = scalar_lea.vmem %s48_s25, 32 }
  0x2f   :  { %p1527_p5 = scmp.ne.s32.totalorder %s48_s25, %s1526_s0  ;;  %p1531_p6 = scmp.lt.s32.totalorder %s48_s25, %s48_s25 }
  0x30   :  { %p1532_p7 = scmp.lt.s32.totalorder %s1530_s12, %s1526_s0 }
  0x32   :  { %p1533_p8 = por %p1532_p7, %p1531_p6 }
  0x34   :  { %p1534_p9 = pnand %p1533_p8, %p1527_p5 }
  0x36   :  { %1537 = shalt.err (!%p1534_p9)
}
  0x37   :  { %50 = dma.hbm_to_vmem [thread:$0]  %s1858_s2, 16, %s48_s25, [#allocation6]  }
  0x38   :  { %s1538_s18 = scalar_lea.hbm %s1859_s3, 16 }
  0x39   :  { %p1539_p10 = scmp.ne.s32.totalorder %s1859_s3, %s1538_s18  ;;  %p1542_p11 = scmp.lt.u32.totalorder %s1538_s18, %s1859_s3 }
  0x3b   :  { %p1544_p12 = pnand %p1542_p11, %p1539_p10 }
  0x3d   :  { %1547 = shalt.err (!%p1544_p12)
}
  0x3e   :  { %s1548_s24 = scalar_lea.vmem %s58_s27, 16  ;;  %s1552_s26 = scalar_lea.vmem %s58_s27, 32 }
  0x3f   :  { %p1549_p13 = scmp.ne.s32.totalorder %s58_s27, %s1548_s24  ;;  %p1553_p0 = scmp.lt.s32.totalorder %s58_s27, %s58_s27 }
  0x40   :  { %p1554_p1 = scmp.lt.s32.totalorder %s1552_s26, %s1548_s24 }
  0x42   :  { %p1555_p2 = por %p1554_p1, %p1553_p0 }
  0x44   :  { %p1556_p3 = pnand %p1555_p2, %p1549_p13 }
  0x46   :  { %1559 = shalt.err (!%p1556_p3)
}
  0x47   :  { %60 = dma.hbm_to_vmem [thread:$0]  %s1859_s3, 16, %s58_s27, [#allocation9]  }
  0x48   :  { %1626 = dma.done.wait [#allocation3], 4096  }
  0x49   :  { %1627 = vsyncadd [#allocation3], 4294963200 }
  0x4a   :  { %1628 = dma.done.wait [#allocation6], 2064  }
  0x4b   :  { %1629 = vsyncadd [#allocation6], 4294965232 }
  0x4c   :  { %1630 = dma.done.wait [#allocation9], 16  }
  0x4d   :  { %1631 = vsyncadd [#allocation9], 4294967280  ;;  %v1408_v0 = vld [vmem:[#allocation5 + $0x40] sm:$0xff]   ;;  %v1410_v2 = vld [vmem:[#allocation5 + $0x48] sm:$0xff]   ;;  %vm913_vm0 = vcmask 7168   ;;  %s1644_s3 = smov [#allocation10]  }
  0x4e   :  { %v1409_v1 = vld [vmem:[#allocation5] sm:$0xff]   ;;  %1202 = vmatprep.subr.bf16.mxu0 %v1408_v0  ;;  %1380 = vmatprep.subr.bf16.mxu1 %v1408_v0  ;;  %v1411_v3 = vld [vmem:[#allocation5 + $0x8] sm:$0xff]   ;;  %v1412_v4 = vld [vmem:[#allocation5 + $0x50] sm:$0xff]   ;;  %s951_s27 = sshll.u32 %s1644_s3, 4  ;;  %s952_s27 = int_to_ptr.vmem [resolvable:$true] %s951_s27 }
  0x4f   :  { %1203 = vmatpush3.bf16.msra.mxu0 %v1409_v1  ;;  %1388 = vmatpush3.bf16.msra.mxu1 %v1409_v1  ;;  %v1413_v5 = vld [vmem:[#allocation5 + $0x10] sm:$0xff]   ;;  %v1414_v6 = vld [vmem:[#allocation5 + $0x58] sm:$0xff]   ;;  %v1416_v8 = vld [vmem:[#allocation5 + $0x60] sm:$0xff]   ;;  %s1560_s28 = scalar_lea.vmem %s952_s27, 2048  ;;  %p1565_p5 = scmp.lt.s32.totalorder %s952_s27, %s952_s27 }
  0x50   :  { %1204 = vmatprep.subr.bf16.mxu0 %v1410_v2  ;;  %1381 = vmatprep.subr.bf16.mxu1 %v1410_v2  ;;  %v1415_v7 = vld [vmem:[#allocation5 + $0x18] sm:$0xff]   ;;  %v1417_v9 = vld [vmem:[#allocation5 + $0x20] sm:$0xff]   ;;  %v1418_v10 = vld [vmem:[#allocation5 + $0x68] sm:$0xff]   ;;  %p1561_p4 = scmp.ne.s32.totalorder %s952_s27, %s1560_s28  ;;  %p1566_p6 = scmp.lt.s32.totalorder %s1560_s28, %s1560_s28 }
  0x51   :  { %v1426_v11 = vld [vmem:[#allocation2 + $0x4] ss:$8 sps:$4 sm:$0xff]   ;;  %v1420_v14 = vld [vmem:[#allocation5 + $0x70] sm:$0xff]   ;;  %v1422_v16 = vld [vmem:[#allocation5 + $0x78] sm:$0xff]  }
  0x52   :  { %v1429_v12 = vld [vmem:[#allocation2 + $0x84] ss:$8 sps:$4 sm:$0xff]   ;;  %426 = vmatprep.mubr.bf16.mxu0 %v1426_v11  ;;  %v1421_v15 = vld [vmem:[#allocation5 + $0x30] sm:$0xff]   ;;  %v1423_v17 = vld [vmem:[#allocation5 + $0x38] sm:$0xff]   ;;  %p1567_p7 = por %p1566_p6, %p1565_p5 }
  0x53   :  { %1205 = vmatpush3.bf16.msra.mxu0 %v1411_v3  ;;  %1389 = vmatpush3.bf16.msra.mxu1 %v1411_v3  ;;  %v1419_v13 = vld [vmem:[#allocation5 + $0x28] sm:$0xff]   ;;  %v1430_v20 = vld [vmem:[#allocation2 + $0x14] ss:$8 sps:$4 sm:$0xff]   ;;  %v1434_v22 = vld [vmem:[#allocation2 + $0x10] ss:$8 sps:$4 sm:$0xff]  }
  0x54   :  { %1206 = vmatprep.subr.bf16.mxu0 %v1412_v4  ;;  %1382 = vmatprep.subr.bf16.mxu1 %v1412_v4  ;;  %v1424_v18 = vld [vmem:[#allocation2] ss:$8 sps:$4 sm:$0xff]   ;;  %v1432_v21 = vld [vmem:[#allocation2 + $0x94] ss:$8 sps:$4 sm:$0xff]   ;;  %v1435_v23 = vld [vmem:[#allocation2 + $0x90] ss:$8 sps:$4 sm:$0xff]   ;;  %p1568_p8 = pnand %p1567_p7, %p1561_p4 }
  0x55   :  { %490 = vmatprep.mubr.bf16.mxu1 %v1429_v12  ;;  %v1427_v19 = vld [vmem:[#allocation2 + $0x80] ss:$8 sps:$4 sm:$0xff]   ;;  %v1436_v24 = vld [vmem:[#allocation2 + $0x24] ss:$8 sps:$4 sm:$0xff]   ;;  %v1442_v28 = vld [vmem:[#allocation2 + $0x34] ss:$8 sps:$4 sm:$0xff]  }
  0x56   :  { %v1438_v25 = vld [vmem:[#allocation2 + $0xa4] ss:$8 sps:$4 sm:$0xff]   ;;  %v1440_v26 = vld [vmem:[#allocation2 + $0x20] ss:$8 sps:$4 sm:$0xff]   ;;  %v1444_v29 = vld [vmem:[#allocation2 + $0xb4] ss:$8 sps:$4 sm:$0xff]  }
  0x57   :  { %1207 = vmatpush3.bf16.msra.mxu0 %v1413_v5  ;;  %1390 = vmatpush3.bf16.msra.mxu1 %v1413_v5  ;;  %v1441_v27 = vld [vmem:[#allocation2 + $0xa0] ss:$8 sps:$4 sm:$0xff]   ;;  %v1446_v30 = vld [vmem:[#allocation2 + $0x30] ss:$8 sps:$4 sm:$0xff]   ;;  %v1448_v32 = vld [vmem:[#allocation2 + $0x44] ss:$8 sps:$4 sm:$0xff]  }
  0x58   :  { %1208 = vmatprep.subr.bf16.mxu0 %v1414_v6  ;;  %1383 = vmatprep.subr.bf16.mxu1 %v1414_v6  ;;  %v1447_v31 = vld [vmem:[#allocation2 + $0xb0] ss:$8 sps:$4 sm:$0xff]   ;;  %v1450_v33 = vld [vmem:[#allocation2 + $0xc4] ss:$8 sps:$4 sm:$0xff]   ;;  %v1452_v34 = vld [vmem:[#allocation2 + $0x40] ss:$8 sps:$4 sm:$0xff]  }
  0x59   :  { %v1453_v35 = vld [vmem:[#allocation2 + $0xc0] ss:$8 sps:$4 sm:$0xff]   ;;  %v1454_v36 = vld [vmem:[#allocation2 + $0x54] ss:$8 sps:$4 sm:$0xff]   ;;  %v1458_v38 = vld [vmem:[#allocation2 + $0x50] ss:$8 sps:$4 sm:$0xff]  }
  0x5a   :  { %v1456_v37 = vld [vmem:[#allocation2 + $0xd4] ss:$8 sps:$4 sm:$0xff]   ;;  %v1459_v39 = vld [vmem:[#allocation2 + $0xd0] ss:$8 sps:$4 sm:$0xff]   ;;  %v1460_v40 = vld [vmem:[#allocation2 + $0x64] ss:$8 sps:$4 sm:$0xff]  }
  0x5b   :  { %1209 = vmatpush3.bf16.msra.mxu0 %v1415_v7  ;;  %1391 = vmatpush3.bf16.msra.mxu1 %v1415_v7  ;;  %v1462_v41 = vld [vmem:[#allocation2 + $0xe4] ss:$8 sps:$4 sm:$0xff]   ;;  %v1464_v42 = vld [vmem:[#allocation2 + $0x60] ss:$8 sps:$4 sm:$0xff]   ;;  %v1466_v44 = vld [vmem:[#allocation2 + $0x74] ss:$8 sps:$4 sm:$0xff]  }
  0x5c   :  { %1210 = vmatprep.subr.bf16.mxu0 %v1416_v8  ;;  %1384 = vmatprep.subr.bf16.mxu1 %v1416_v8  ;;  %v1465_v43 = vld [vmem:[#allocation2 + $0xe0] ss:$8 sps:$4 sm:$0xff]   ;;  %v1468_v45 = vld [vmem:[#allocation2 + $0xf4] ss:$8 sps:$4 sm:$0xff]   ;;  %v1470_v46 = vld [vmem:[#allocation2 + $0x70] ss:$8 sps:$4 sm:$0xff]  }
  0x5d   :  { %v1471_v47 = vld [vmem:[#allocation2 + $0xf0] ss:$8 sps:$4 sm:$0xff]   ;;  %v1737_v48 = vld [vmem:[#allocation7] sm:$0x1]  ;;  %v1740_v53 = vld [vmem:[#allocation8] ss:$0 sm:$0xff] }
  0x5f   :  { %1211 = vmatpush3.bf16.msra.mxu0 %v1417_v9  ;;  %1392 = vmatpush3.bf16.msra.mxu1 %v1417_v9 }
  0x60   :  { %1212 = vmatprep.subr.bf16.mxu0 %v1418_v10  ;;  %1385 = vmatprep.subr.bf16.mxu1 %v1418_v10 }
  0x63   :  { %1213 = vmatpush3.bf16.msra.mxu0 %v1419_v13  ;;  %1393 = vmatpush3.bf16.msra.mxu1 %v1419_v13 }
  0x64   :  { %1214 = vmatprep.subr.bf16.mxu0 %v1420_v14  ;;  %1386 = vmatprep.subr.bf16.mxu1 %v1420_v14 }
  0x67   :  { %1215 = vmatpush3.bf16.msra.mxu0 %v1421_v15  ;;  %1394 = vmatpush3.bf16.msra.mxu1 %v1421_v15 }
  0x68   :  { %1216 = vmatprep.subr.bf16.mxu0 %v1422_v16  ;;  %1387 = vmatprep.subr.bf16.mxu1 %v1422_v16 }
  0x6b   :  { %1217 = vmatpush3.bf16.msra.mxu0 %v1423_v17  ;;  %1395 = vmatpush3.bf16.msra.mxu1 %v1423_v17 }
  0x6e   :  { %427 = vmatmul.mubr.bf16.vlgmr.msra.gmra.mrb[0].mxu0 %v1424_v18  ;;  %491 = vmatmul.mubr.bf16.vlgmr.msra.gmra.mrb[0].mxu1 %v1427_v19 }
  0x6f   :  { %434 = vmatprep.mubr.bf16.mxu0 %v1430_v20  ;;  %498 = vmatprep.mubr.bf16.mxu1 %v1432_v21 }
  0x76   :  { %435 = vmatmul.mubr.bf16.gmra.mrb[4].mxu0 %v1434_v22  ;;  %499 = vmatmul.mubr.bf16.gmra.mrb[4].mxu1 %v1435_v23 }
  0x77   :  { %442 = vmatprep.mubr.bf16.mxu0 %v1436_v24  ;;  %506 = vmatprep.mubr.bf16.mxu1 %v1438_v25 }
  0x7e   :  { %443 = vmatmul.mubr.bf16.gmra.mrb[8].mxu0 %v1440_v26  ;;  %507 = vmatmul.mubr.bf16.gmra.mrb[8].mxu1 %v1441_v27 }
  0x7f   :  { %450 = vmatprep.mubr.bf16.mxu0 %v1442_v28  ;;  %514 = vmatprep.mubr.bf16.mxu1 %v1444_v29 }
  0x86   :  { %451 = vmatmul.mubr.bf16.gmra.mrb[12].mxu0 %v1446_v30  ;;  %515 = vmatmul.mubr.bf16.gmra.mrb[12].mxu1 %v1447_v31 }
  0x87   :  { %458 = vmatprep.mubr.bf16.mxu0 %v1448_v32  ;;  %522 = vmatprep.mubr.bf16.mxu1 %v1450_v33 }
  0x8e   :  { %459 = vmatmul.mubr.bf16.gmra.mrb[16].mxu0 %v1452_v34  ;;  %523 = vmatmul.mubr.bf16.gmra.mrb[16].mxu1 %v1453_v35 }
  0x8f   :  { %466 = vmatprep.mubr.bf16.mxu0 %v1454_v36  ;;  %530 = vmatprep.mubr.bf16.mxu1 %v1456_v37 }
  0x96   :  { %467 = vmatmul.mubr.bf16.gmra.mrb[20].mxu0 %v1458_v38  ;;  %531 = vmatmul.mubr.bf16.gmra.mrb[20].mxu1 %v1459_v39 }
  0x97   :  { %474 = vmatprep.mubr.bf16.mxu0 %v1460_v40  ;;  %538 = vmatprep.mubr.bf16.mxu1 %v1462_v41 }
  0x9e   :  { %475 = vmatmul.mubr.bf16.gmra.mrb[24].mxu0 %v1464_v42  ;;  %539 = vmatmul.mubr.bf16.gmra.mrb[24].mxu1 %v1465_v43 }
  0x9f   :  { %482 = vmatprep.mubr.bf16.mxu0 %v1466_v44  ;;  %546 = vmatprep.mubr.bf16.mxu1 %v1468_v45 }
  0xa6   :  { %483 = vmatmul.mubr.bf16.gmra.mrb[28].mxu0 %v1470_v46  ;;  %547 = vmatmul.mubr.bf16.gmra.mrb[28].mxu1 %v1471_v47 }
  0xa7   :  { %1346 = vmatprep.mubr.f32.mxu1 %v1737_v48 }
 0x141   :  { %v1218_v49 = vpop.f32.mrb[0].mxu0  ;;  %v1266_v50 = vpop.f32.mrb[0].mxu1 }
 0x142   :  { %v1219_v51 = vpop.f32.mrb[1].mxu0  ;;  %v1267_v52 = vpop.f32.mrb[1].mxu1 }
 0x143   :  { %v1220_v54 = vadd.f32 %v1219_v51, %v1218_v49  ;;  %v1268_v55 = vadd.f32 %v1267_v52, %v1266_v50  ;;  %v1221_v56 = vpop.f32.mrb[2].mxu0  ;;  %v1269_v57 = vpop.f32.mrb[2].mxu1 }
 0x144   :  { %v1222_v58 = vpop.f32.mrb[3].mxu0  ;;  %v1270_v59 = vpop.f32.mrb[3].mxu1 }
 0x145   :  { %v1223_v60 = vadd.f32 %v1222_v58, %v1221_v56  ;;  %v1271_v61 = vadd.f32 %v1270_v59, %v1269_v57  ;;  %v817_v62 = vmul.f32 %v1220_v54, %v1740_v53  ;;  %v833_v4 = vmul.f32 %v1268_v55, %v1740_v53 }
 0x147   :  { %v1110_v63 = vpack.c.bf16 %v1223_v60, %v1220_v54  ;;  %v1150_v0 = vpack.c.bf16 %v1271_v61, %v1268_v55  ;;  %849 = vadd.xlane.f32.xlu0 %v817_v62  ;;  %v834_v1 = vmul.f32 %v1271_v61, %v1740_v53  ;;  %v818_v16 = vmul.f32 %v1223_v60, %v1740_v53 }
 0x149   :  { %1111 = vst [vmem:[#allocation10] sm:$0xff] %v1110_v63   ;;  %1194 = vst [vmem:[#allocation10 + $0x40] sm:$0xff] %v1150_v0   ;;  %v1272_v2 = vpop.f32.mrb[4].mxu1  ;;  %883 = vadd.xlane.f32.xlu1 %v834_v1  ;;  %v1224_v3 = vpop.f32.mrb[4].mxu0  ;;  %1349 = vmatprep.subr.bf16.mxu1 %v1150_v0 }
 0x14a   :  { %v1225_v5 = vpop.f32.mrb[5].mxu0  ;;  %v1273_v6 = vpop.f32.mrb[5].mxu1  ;;  %1351 = vmatpush3.bf16.xpose.msra.mxu1 %v1110_v63 }
 0x14b   :  { %v1226_v7 = vadd.f32 %v1225_v5, %v1224_v3  ;;  %v1274_v8 = vadd.f32 %v1273_v6, %v1272_v2  ;;  %v1227_v9 = vpop.f32.mrb[6].mxu0  ;;  %v1275_v10 = vpop.f32.mrb[6].mxu1  ;;  %881 = vadd.xlane.f32.xlu0 %v833_v4 }
 0x14c   :  { %v1228_v11 = vpop.f32.mrb[7].mxu0  ;;  %v1276_v12 = vpop.f32.mrb[7].mxu1 }
 0x14d   :  { %v1229_v13 = vadd.f32 %v1228_v11, %v1227_v9  ;;  %v1277_v14 = vadd.f32 %v1276_v12, %v1275_v10  ;;  %v819_v15 = vmul.f32 %v1226_v7, %v1740_v53  ;;  %v835_v22 = vmul.f32 %v1274_v8, %v1740_v53 }
 0x14f   :  { %v1115_v17 = vpack.c.bf16 %v1229_v13, %v1226_v7  ;;  %v1155_v18 = vpack.c.bf16 %v1277_v14, %v1274_v8  ;;  %853 = vadd.xlane.f32.xlu1 %v819_v15  ;;  %851 = vadd.xlane.f32.xlu0 %v818_v16  ;;  %v820_v21 = vmul.f32 %v1229_v13, %v1740_v53 }
 0x150   :  { %v836_v33 = vmul.f32 %v1277_v14, %v1740_v53 }
 0x151   :  { %1187 = vst [vmem:[#allocation10 + $0x8] sm:$0xff] %v1115_v17   ;;  %1195 = vst [vmem:[#allocation10 + $0x48] sm:$0xff] %v1155_v18   ;;  %v1230_v19 = vpop.f32.mrb[8].mxu0  ;;  %v1278_v20 = vpop.f32.mrb[8].mxu1  ;;  %1353 = vmatprep.subr.bf16.mxu1 %v1155_v18 }
 0x152   :  { %v1231_v23 = vpop.f32.mrb[9].mxu0  ;;  %v1279_v24 = vpop.f32.mrb[9].mxu1  ;;  %1355 = vmatpush3.bf16.xpose.msra.mxu1 %v1115_v17 }
 0x153   :  { %v1232_v25 = vadd.f32 %v1231_v23, %v1230_v19  ;;  %v1280_v26 = vadd.f32 %v1279_v24, %v1278_v20  ;;  %v1233_v27 = vpop.f32.mrb[10].mxu0  ;;  %v1281_v28 = vpop.f32.mrb[10].mxu1  ;;  %855 = vadd.xlane.f32.xlu1 %v820_v21  ;;  %885 = vadd.xlane.f32.xlu0 %v835_v22 }
 0x154   :  { %v1234_v29 = vpop.f32.mrb[11].mxu0  ;;  %v1282_v30 = vpop.f32.mrb[11].mxu1 }
 0x155   :  { %v1235_v31 = vadd.f32 %v1234_v29, %v1233_v27  ;;  %v1283_v32 = vadd.f32 %v1282_v30, %v1281_v28  ;;  %v821_v34 = vmul.f32 %v1232_v25, %v1740_v53  ;;  %v837_v40 = vmul.f32 %v1280_v26, %v1740_v53 }
 0x157   :  { %v1120_v35 = vpack.c.bf16 %v1235_v31, %v1232_v25  ;;  %v1160_v36 = vpack.c.bf16 %v1283_v32, %v1280_v26  ;;  %887 = vadd.xlane.f32.xlu1 %v836_v33  ;;  %857 = vadd.xlane.f32.xlu0 %v821_v34  ;;  %v822_v39 = vmul.f32 %v1235_v31, %v1740_v53 }
 0x158   :  { %v838_v52 = vmul.f32 %v1283_v32, %v1740_v53 }
 0x159   :  { %1188 = vst [vmem:[#allocation10 + $0x10] sm:$0xff] %v1120_v35   ;;  %1196 = vst [vmem:[#allocation10 + $0x50] sm:$0xff] %v1160_v36   ;;  %v1236_v37 = vpop.f32.mrb[12].mxu0  ;;  %v1284_v38 = vpop.f32.mrb[12].mxu1  ;;  %1357 = vmatprep.subr.bf16.mxu1 %v1160_v36 }
 0x15a   :  { %v1237_v41 = vpop.f32.mrb[13].mxu0  ;;  %v1285_v42 = vpop.f32.mrb[13].mxu1  ;;  %1359 = vmatpush3.bf16.xpose.msra.mxu1 %v1120_v35 }
 0x15b   :  { %v1238_v43 = vadd.f32 %v1237_v41, %v1236_v37  ;;  %v1286_v44 = vadd.f32 %v1285_v42, %v1284_v38  ;;  %v1239_v45 = vpop.f32.mrb[14].mxu0  ;;  %v1287_v46 = vpop.f32.mrb[14].mxu1  ;;  %859 = vadd.xlane.f32.xlu1 %v822_v39  ;;  %889 = vadd.xlane.f32.xlu0 %v837_v40 }
 0x15c   :  { %v1240_v47 = vpop.f32.mrb[15].mxu0  ;;  %v1288_v49 = vpop.f32.mrb[15].mxu1 }
 0x15d   :  { %v1241_v50 = vadd.f32 %v1240_v47, %v1239_v45  ;;  %v1289_v51 = vadd.f32 %v1288_v49, %v1287_v46  ;;  %v823_v54 = vmul.f32 %v1238_v43, %v1740_v53  ;;  %v839_v60 = vmul.f32 %v1286_v44, %v1740_v53 }
 0x15f   :  { %v1125_v55 = vpack.c.bf16 %v1241_v50, %v1238_v43  ;;  %v1165_v56 = vpack.c.bf16 %v1289_v51, %v1286_v44  ;;  %891 = vadd.xlane.f32.xlu1 %v838_v52  ;;  %861 = vadd.xlane.f32.xlu0 %v823_v54  ;;  %v824_v59 = vmul.f32 %v1241_v50, %v1740_v53 }
 0x160   :  { %v840_v7 = vmul.f32 %v1289_v51, %v1740_v53 }
 0x161   :  { %1189 = vst [vmem:[#allocation10 + $0x18] sm:$0xff] %v1125_v55   ;;  %1197 = vst [vmem:[#allocation10 + $0x58] sm:$0xff] %v1165_v56   ;;  %v1242_v57 = vpop.f32.mrb[16].mxu0  ;;  %v1290_v58 = vpop.f32.mrb[16].mxu1  ;;  %1361 = vmatprep.subr.bf16.mxu1 %v1165_v56 }
 0x162   :  { %v1243_v61 = vpop.f32.mrb[17].mxu0  ;;  %v1291_v62 = vpop.f32.mrb[17].mxu1  ;;  %1363 = vmatpush3.bf16.xpose.msra.mxu1 %v1125_v55 }
 0x163   :  { %v1244_v63 = vadd.f32 %v1243_v61, %v1242_v57  ;;  %v1292_v0 = vadd.f32 %v1291_v62, %v1290_v58  ;;  %v1245_v1 = vpop.f32.mrb[18].mxu0  ;;  %v1293_v2 = vpop.f32.mrb[18].mxu1  ;;  %863 = vadd.xlane.f32.xlu1 %v824_v59  ;;  %893 = vadd.xlane.f32.xlu0 %v839_v60 }
 0x164   :  { %v1246_v3 = vpop.f32.mrb[19].mxu0  ;;  %v1294_v4 = vpop.f32.mrb[19].mxu1 }
 0x165   :  { %v1247_v5 = vadd.f32 %v1246_v3, %v1245_v1  ;;  %v1295_v6 = vadd.f32 %v1294_v4, %v1293_v2  ;;  %v825_v8 = vmul.f32 %v1244_v63, %v1740_v53  ;;  %v841_v14 = vmul.f32 %v1292_v0, %v1740_v53 }
 0x167   :  { %v1130_v9 = vpack.c.bf16 %v1247_v5, %v1244_v63  ;;  %v1170_v10 = vpack.c.bf16 %v1295_v6, %v1292_v0  ;;  %895 = vadd.xlane.f32.xlu1 %v840_v7  ;;  %865 = vadd.xlane.f32.xlu0 %v825_v8  ;;  %v826_v13 = vmul.f32 %v1247_v5, %v1740_v53 }
 0x168   :  { %v842_v25 = vmul.f32 %v1295_v6, %v1740_v53 }
 0x169   :  { %1190 = vst [vmem:[#allocation10 + $0x20] sm:$0xff] %v1130_v9   ;;  %1198 = vst [vmem:[#allocation10 + $0x60] sm:$0xff] %v1170_v10   ;;  %v1248_v11 = vpop.f32.mrb[20].mxu0  ;;  %v1296_v12 = vpop.f32.mrb[20].mxu1  ;;  %1365 = vmatprep.subr.bf16.mxu1 %v1170_v10 }
 0x16a   :  { %v1249_v15 = vpop.f32.mrb[21].mxu0  ;;  %v1297_v16 = vpop.f32.mrb[21].mxu1  ;;  %1367 = vmatpush3.bf16.xpose.msra.mxu1 %v1130_v9 }
 0x16b   :  { %v1250_v17 = vadd.f32 %v1249_v15, %v1248_v11  ;;  %v1298_v18 = vadd.f32 %v1297_v16, %v1296_v12  ;;  %v1251_v19 = vpop.f32.mrb[22].mxu0  ;;  %v1299_v20 = vpop.f32.mrb[22].mxu1  ;;  %867 = vadd.xlane.f32.xlu1 %v826_v13  ;;  %897 = vadd.xlane.f32.xlu0 %v841_v14 }
 0x16c   :  { %v1252_v21 = vpop.f32.mrb[23].mxu0  ;;  %v1300_v22 = vpop.f32.mrb[23].mxu1 }
 0x16d   :  { %v1253_v23 = vadd.f32 %v1252_v21, %v1251_v19  ;;  %v1301_v24 = vadd.f32 %v1300_v22, %v1299_v20  ;;  %v827_v26 = vmul.f32 %v1250_v17, %v1740_v53  ;;  %v843_v32 = vmul.f32 %v1298_v18, %v1740_v53 }
 0x16f   :  { %v1135_v27 = vpack.c.bf16 %v1253_v23, %v1250_v17  ;;  %v1175_v28 = vpack.c.bf16 %v1301_v24, %v1298_v18  ;;  %899 = vadd.xlane.f32.xlu1 %v842_v25  ;;  %869 = vadd.xlane.f32.xlu0 %v827_v26  ;;  %v828_v31 = vmul.f32 %v1253_v23, %v1740_v53 }
 0x170   :  { %v844_v43 = vmul.f32 %v1301_v24, %v1740_v53 }
 0x171   :  { %1191 = vst [vmem:[#allocation10 + $0x28] sm:$0xff] %v1135_v27   ;;  %1199 = vst [vmem:[#allocation10 + $0x68] sm:$0xff] %v1175_v28   ;;  %v1254_v29 = vpop.f32.mrb[24].mxu0  ;;  %v1302_v30 = vpop.f32.mrb[24].mxu1  ;;  %1369 = vmatprep.subr.bf16.mxu1 %v1175_v28 }
 0x172   :  { %v1255_v33 = vpop.f32.mrb[25].mxu0  ;;  %v1303_v34 = vpop.f32.mrb[25].mxu1  ;;  %1371 = vmatpush3.bf16.xpose.msra.mxu1 %v1135_v27 }
 0x173   :  { %v1256_v35 = vadd.f32 %v1255_v33, %v1254_v29  ;;  %v1304_v36 = vadd.f32 %v1303_v34, %v1302_v30  ;;  %v1257_v37 = vpop.f32.mrb[26].mxu0  ;;  %v1305_v38 = vpop.f32.mrb[26].mxu1  ;;  %871 = vadd.xlane.f32.xlu1 %v828_v31  ;;  %901 = vadd.xlane.f32.xlu0 %v843_v32 }
 0x174   :  { %v1258_v39 = vpop.f32.mrb[27].mxu0  ;;  %v1306_v40 = vpop.f32.mrb[27].mxu1 }
 0x175   :  { %v1259_v41 = vadd.f32 %v1258_v39, %v1257_v37  ;;  %v1307_v42 = vadd.f32 %v1306_v40, %v1305_v38  ;;  %v829_v44 = vmul.f32 %v1256_v35, %v1740_v53  ;;  %v845_v51 = vmul.f32 %v1304_v36, %v1740_v53 }
 0x177   :  { %v1140_v45 = vpack.c.bf16 %v1259_v41, %v1256_v35  ;;  %v1180_v46 = vpack.c.bf16 %v1307_v42, %v1304_v36  ;;  %903 = vadd.xlane.f32.xlu1 %v844_v43  ;;  %873 = vadd.xlane.f32.xlu0 %v829_v44  ;;  %v830_v50 = vmul.f32 %v1259_v41, %v1740_v53 }
 0x178   :  { %v846_v63 = vmul.f32 %v1307_v42, %v1740_v53 }
 0x179   :  { %1192 = vst [vmem:[#allocation10 + $0x30] sm:$0xff] %v1140_v45   ;;  %1200 = vst [vmem:[#allocation10 + $0x70] sm:$0xff] %v1180_v46   ;;  %v1260_v47 = vpop.f32.mrb[28].mxu0  ;;  %v1308_v49 = vpop.f32.mrb[28].mxu1  ;;  %1373 = vmatprep.subr.bf16.mxu1 %v1180_v46 }
 0x17a   :  { %v1261_v52 = vpop.f32.mrb[29].mxu0  ;;  %v1309_v54 = vpop.f32.mrb[29].mxu1  ;;  %1375 = vmatpush3.bf16.xpose.msra.mxu1 %v1140_v45 }
 0x17b   :  { %v1262_v55 = vadd.f32 %v1261_v52, %v1260_v47  ;;  %v1310_v56 = vadd.f32 %v1309_v54, %v1308_v49  ;;  %v1263_v57 = vpop.f32.mrb[30].mxu0  ;;  %v1311_v58 = vpop.f32.mrb[30].mxu1  ;;  %875 = vadd.xlane.f32.xlu1 %v830_v50  ;;  %905 = vadd.xlane.f32.xlu0 %v845_v51 }
 0x17c   :  { %v1264_v59 = vpop.f32.mrb[31].mxu0  ;;  %v1312_v60 = vpop.f32.mrb[31].mxu1 }
 0x17d   :  { %v1265_v61 = vadd.f32 %v1264_v59, %v1263_v57  ;;  %v1313_v62 = vadd.f32 %v1312_v60, %v1311_v58  ;;  %v831_v0 = vmul.f32 %v1262_v55, %v1740_v53  ;;  %v847_v5 = vmul.f32 %v1310_v56, %v1740_v53 }
 0x17f   :  { %v1145_v1 = vpack.c.bf16 %v1265_v61, %v1262_v55  ;;  %v1185_v2 = vpack.c.bf16 %v1313_v62, %v1310_v56  ;;  %907 = vadd.xlane.f32.xlu1 %v846_v63  ;;  %877 = vadd.xlane.f32.xlu0 %v831_v0  ;;  %v848_v3 = vmul.f32 %v1313_v62, %v1740_v53 }
 0x180   :  { %v832_v4 = vmul.f32 %v1265_v61, %v1740_v53 }
 0x181   :  { %1193 = vst [vmem:[#allocation10 + $0x38] sm:$0xff] %v1145_v1   ;;  %1201 = vst [vmem:[#allocation10 + $0x78] sm:$0xff] %v1185_v2   ;;  %1377 = vmatprep.subr.bf16.mxu1 %v1185_v2 }
 0x182   :  { %1379 = vmatpush3.bf16.xpose.msra.mxu1 %v1145_v1 }
 0x183   :  { %879 = vadd.xlane.f32.xlu1 %v832_v4  ;;  %909 = vadd.xlane.f32.xlu0 %v847_v5 }
 0x187   :  { %911 = vadd.xlane.f32.xlu1 %v848_v3 }
 0x189   :  { %1347 = vmatmul.mubr.f32.vlgmr.msra.gmra.mrb[32].mxu1 %v1737_v48 }
 0x1d4   :  { %v850_v6 = vpop.xlane.xlu0 %849 }
 0x1d5   :  { %914 = vst.msk [vmem:[#allocation13] sm:$0xff] %vm913_vm0, %v850_v6 }
 0x1d6   :  { %v884_v7 = vpop.xlane.xlu1 %883 }
 0x1d7   :  { %931 = vst.msk [vmem:[#allocation13 + $0x88] sm:$0xff] %vm913_vm0, %v884_v7 }
 0x1d8   :  { %v882_v8 = vpop.xlane.xlu0 %881 }
 0x1d9   :  { %930 = vst.msk [vmem:[#allocation13 + $0x80] sm:$0xff] %vm913_vm0, %v882_v8 }
 0x1dc   :  { %v854_v9 = vpop.xlane.xlu1 %853  ;;  %v852_v10 = vpop.xlane.xlu0 %851 }
 0x1dd   :  { %916 = vst.msk [vmem:[#allocation13 + $0x10] sm:$0xff] %vm913_vm0, %v854_v9  ;;  %915 = vst.msk [vmem:[#allocation13 + $0x8] sm:$0xff] %vm913_vm0, %v852_v10 }
 0x1e0   :  { %v856_v53 = vpop.xlane.xlu1 %855  ;;  %v886_v11 = vpop.xlane.xlu0 %885 }
 0x1e1   :  { %917 = vst.msk [vmem:[#allocation13 + $0x18] sm:$0xff] %vm913_vm0, %v856_v53  ;;  %932 = vst.msk [vmem:[#allocation13 + $0x90] sm:$0xff] %vm913_vm0, %v886_v11 }
 0x1e4   :  { %v888_v48 = vpop.xlane.xlu1 %887  ;;  %v858_v12 = vpop.xlane.xlu0 %857 }
 0x1e5   :  { %933 = vst.msk [vmem:[#allocation13 + $0x98] sm:$0xff] %vm913_vm0, %v888_v48  ;;  %918 = vst.msk [vmem:[#allocation13 + $0x20] sm:$0xff] %vm913_vm0, %v858_v12 }
 0x1e6   :  { %1571 = shalt.err (!%p1568_p8)
}
 0x1e7   :  { %s1572_s9 = scalar_lea.hbm %s1860_s4, 2048 }
 0x1e8   :  { %p1573_p9 = scmp.ne.s32.totalorder %s1860_s4, %s1572_s9  ;;  %p1576_p10 = scmp.lt.u32.totalorder %s1572_s9, %s1860_s4 }
 0x1ea   :  { %p1578_p11 = pnand %p1576_p10, %p1573_p9 }
 0x1ec   :  { %1581 = shalt.err (!%p1578_p11)
}
 0x1ed   :  { %957 = dma.vmem_to_hbm [thread:$0]  %s952_s27, 2048, %s1860_s4, [#allocation4], %s1637_s7, %s1637_s7, %s1638_s8   ;;  %v860_v13 = vpop.xlane.xlu1 %859  ;;  %v890_v14 = vpop.xlane.xlu0 %889  ;;  %v1645_v36 = vmov 1966171168   ;;  %v793_v38 = vlaneseq }
 0x1ee   :  { %919 = vst.msk [vmem:[#allocation13 + $0x28] sm:$0xff] %vm913_vm0, %v860_v13  ;;  %934 = vst.msk [vmem:[#allocation13 + $0xa0] sm:$0xff] %vm913_vm0, %v890_v14  ;;  %v791_v37 = vunpack.c.l.s4 %v1645_v36  ;;  %s1646_s4 = smov [#allocation11]   ;;  %s1647_s8 = smov [#allocation13]  }
 0x1ef   :  { %v794_v40 = vshrl.u32 %v793_v38, 7  ;;  %s964_s7 = sshll.u32 %s1646_s4, 4  ;;  %s973_s15 = sshll.u32 %s1647_s8, 4  ;;  %vm807_vm1 = vcmp.lt.s32.totalorder %v793_v38, 256  ;;  %s965_s7 = int_to_ptr.vmem [resolvable:$true] %s964_s7  ;;  %s1822_s15 = int_to_ptr.vmem [resolvable:$true] %s973_s15 }
 0x1f0   :  { %v792_v39 = vunpack.c.0.s8 %v791_v37  ;;  %s1582_s16 = scalar_lea.vmem %s965_s7, 32  ;;  %p1587_p13 = scmp.lt.s32.totalorder %s965_s7, %s965_s7 }
 0x1f1   :  { %v892_v15 = vpop.xlane.xlu1 %891  ;;  %v862_v16 = vpop.xlane.xlu0 %861  ;;  %p1583_p12 = scmp.ne.s32.totalorder %s965_s7, %s1582_s16  ;;  %p1588_p0 = scmp.lt.s32.totalorder %s1582_s16, %s1582_s16 }
 0x1f2   :  { %935 = vst.msk [vmem:[#allocation13 + $0xa8] sm:$0xff] %vm913_vm0, %v892_v15  ;;  %920 = vst.msk [vmem:[#allocation13 + $0x30] sm:$0xff] %vm913_vm0, %v862_v16  ;;  %v795_v42 = vsub.s32 %v792_v39, %v794_v40 }
 0x1f3   :  { %p1589_p1 = por %p1588_p0, %p1587_p13 }
 0x1f5   :  { %v864_v17 = vpop.xlane.xlu1 %863  ;;  %v894_v18 = vpop.xlane.xlu0 %893  ;;  %p1590_p2 = pnand %p1589_p1, %p1583_p12 }
 0x1f6   :  { %921 = vst.msk [vmem:[#allocation13 + $0x38] sm:$0xff] %vm913_vm0, %v864_v17  ;;  %936 = vst.msk [vmem:[#allocation13 + $0xb0] sm:$0xff] %vm913_vm0, %v894_v18 }
 0x1f9   :  { %v896_v19 = vpop.xlane.xlu1 %895  ;;  %v866_v20 = vpop.xlane.xlu0 %865 }
 0x1fa   :  { %937 = vst.msk [vmem:[#allocation13 + $0xb8] sm:$0xff] %vm913_vm0, %v896_v19  ;;  %922 = vst.msk [vmem:[#allocation13 + $0x40] sm:$0xff] %vm913_vm0, %v866_v20 }
 0x1fd   :  { %v868_v21 = vpop.xlane.xlu1 %867  ;;  %v898_v22 = vpop.xlane.xlu0 %897 }
 0x1fe   :  { %923 = vst.msk [vmem:[#allocation13 + $0x48] sm:$0xff] %vm913_vm0, %v868_v21  ;;  %938 = vst.msk [vmem:[#allocation13 + $0xc0] sm:$0xff] %vm913_vm0, %v898_v22 }
 0x201   :  { %v900_v23 = vpop.xlane.xlu1 %899  ;;  %v870_v24 = vpop.xlane.xlu0 %869 }
 0x202   :  { %939 = vst.msk [vmem:[#allocation13 + $0xc8] sm:$0xff] %vm913_vm0, %v900_v23  ;;  %924 = vst.msk [vmem:[#allocation13 + $0x50] sm:$0xff] %vm913_vm0, %v870_v24 }
 0x205   :  { %v872_v25 = vpop.xlane.xlu1 %871  ;;  %v902_v26 = vpop.xlane.xlu0 %901 }
 0x206   :  { %925 = vst.msk [vmem:[#allocation13 + $0x58] sm:$0xff] %vm913_vm0, %v872_v25  ;;  %940 = vst.msk [vmem:[#allocation13 + $0xd0] sm:$0xff] %vm913_vm0, %v902_v26 }
 0x209   :  { %v904_v27 = vpop.xlane.xlu1 %903  ;;  %v874_v28 = vpop.xlane.xlu0 %873 }
 0x20a   :  { %941 = vst.msk [vmem:[#allocation13 + $0xd8] sm:$0xff] %vm913_vm0, %v904_v27  ;;  %926 = vst.msk [vmem:[#allocation13 + $0x60] sm:$0xff] %vm913_vm0, %v874_v28 }
 0x20d   :  { %v876_v29 = vpop.xlane.xlu1 %875  ;;  %v906_v30 = vpop.xlane.xlu0 %905 }
 0x20e   :  { %927 = vst.msk [vmem:[#allocation13 + $0x68] sm:$0xff] %vm913_vm0, %v876_v29  ;;  %942 = vst.msk [vmem:[#allocation13 + $0xe0] sm:$0xff] %vm913_vm0, %v906_v30 }
 0x211   :  { %v908_v31 = vpop.xlane.xlu1 %907  ;;  %v878_v32 = vpop.xlane.xlu0 %877 }
 0x212   :  { %943 = vst.msk [vmem:[#allocation13 + $0xe8] sm:$0xff] %vm913_vm0, %v908_v31  ;;  %928 = vst.msk [vmem:[#allocation13 + $0x70] sm:$0xff] %vm913_vm0, %v878_v32 }
 0x215   :  { %v880_v33 = vpop.xlane.xlu1 %879  ;;  %v910_v34 = vpop.xlane.xlu0 %909 }
 0x216   :  { %929 = vst.msk [vmem:[#allocation13 + $0x78] sm:$0xff] %vm913_vm0, %v880_v33  ;;  %944 = vst.msk [vmem:[#allocation13 + $0xf0] sm:$0xff] %vm913_vm0, %v910_v34 }
 0x219   :  { %v912_v35 = vpop.xlane.xlu1 %911 }
 0x21a   :  { %945 = vst.msk [vmem:[#allocation13 + $0xf8] sm:$0xff] %vm913_vm0, %v912_v35 }
 0x25c   :  { %v782_v41 = vpop.f32.mrb[32].mxu1 }
 0x25d   :  { %v784_v43 = vpop.f32.mrb[33].mxu1 }
 0x25e   :  { %v789_v44 = vcombine.low %v782_v41, %v784_v43 }
 0x260   :  { %v796_v45 = vrot.slane %v789_v44, %v795_v42 }
 0x262   :  { %v803_v46 = vrot.slane %v796_v45, %v795_v42 }
 0x264   :  { %809 = vst.msk [vmem:[#allocation11] sm:$0x3] %vm807_vm1, %v803_v46 }
 0x265   :  { %1593 = shalt.err (!%p1590_p2)
}
 0x266   :  { %s1594_s19 = scalar_lea.hbm %s1861_s5, 32 }
 0x267   :  { %p1595_p3 = scmp.ne.s32.totalorder %s1861_s5, %s1594_s19  ;;  %p1598_p4 = scmp.lt.u32.totalorder %s1594_s19, %s1861_s5 }
 0x269   :  { %p1600_p5 = pnand %p1598_p4, %p1595_p3 }
 0x26b   :  { %1603 = shalt.err (!%p1600_p5)
}
 0x26c   :  { %967 = dma.vmem_to_hbm [thread:$0]  %s965_s7, 32, %s1861_s5, [#allocation12]  }
 0x26d   :  { %s1604_s25 = scalar_lea.vmem %s1822_s15, 4096  ;;  %p1609_p7 = scmp.lt.s32.totalorder %s1822_s15, %s1822_s15 }
 0x26e   :  { %p1605_p6 = scmp.ne.s32.totalorder %s1822_s15, %s1604_s25  ;;  %p1610_p8 = scmp.lt.s32.totalorder %s1604_s25, %s1604_s25 }
 0x270   :  { %p1611_p9 = por %p1610_p8, %p1609_p7 }
 0x272   :  { %p1612_p10 = pnand %p1611_p9, %p1605_p6 }
 0x274   :  { %1615 = shalt.err (!%p1612_p10)
}
 0x275   :  { %s1616_s28 = scalar_lea.hbm %s1862_s6, 4096 }
 0x276   :  { %p1617_p11 = scmp.ne.s32.totalorder %s1862_s6, %s1616_s28  ;;  %p1620_p12 = scmp.lt.u32.totalorder %s1616_s28, %s1862_s6 }
 0x278   :  { %p1622_p13 = pnand %p1620_p12, %p1617_p11 }
 0x27a   :  { %1625 = shalt.err (!%p1622_p13)
}
 0x27b   :  { %979 = dma.vmem_to_hbm [thread:$0]  %s1822_s15, 4096, %s1862_s6, [#allocation12], %s1640_s1, %s1640_s1, %s1641_s21  }
 0x27c   :  { %1632 = dma.done.wait [#allocation4], 2048  }
 0x27d   :  { %1633 = vsyncadd [#allocation4], 4294965248 }
 0x27e   :  { %1634 = dma.done.wait [#allocation12], 4128  }
 0x27f   :  { %1635 = vsyncadd [#allocation12], 4294963168 }
 0x280   :  { %989 = vsyncpa [#allocation3], 1 }
 0x281   :  { %990 = vsyncpa [#allocation6], 1 }
 0x282   :  { %991 = vsyncpa [#allocation9], 1 }
 0x283   :  { %992 = vsyncpa [#allocation4], 1 }
 0x284   :  { %993 = vsyncpa [#allocation12], 1 }

</bundles_post_ra>
